<compile_context>
chip_gen: v5e
topology: v5e:2x2
jax: 0.10.0
libtpu: 0.0.40
codegen_flags: <defaults>
</compile_context>

<pallas_src>
import functools

import jax
import jax.numpy as jnp
from jax.experimental import pallas as pl
from jax.experimental.pallas import tpu as pltpu

SUBLANE = 8


def _round_up(n, m):
    return ((n + m - 1) // m) * m


def meta_learner_kernel(x_ref, w1_ref, b1_ref, w2_ref, b2_ref, out_ref):
    # x_ref:  (tb, D)  f32   streamed per batch tile
    # w1_ref: (D, H)   f32   VMEM-resident (constant index_map)
    # b1_ref: (1, H)   f32   VMEM-resident
    # w2_ref: (H, O)   f32   VMEM-resident
    # b2_ref: (1, O)   f32   VMEM-resident
    # out_ref:(tb, O)  f32   narrow (O=7) output; masked store, tiny writeback
    x = x_ref[...]
    h = jnp.dot(x, w1_ref[...], preferred_element_type=jnp.float32) + b1_ref[...]
    h = jnp.where(h >= 0.0, h, 0.01 * h)        # LeakyReLU(negative_slope=0.01), VPU
    # Dropout -> identity (eval mode).
    y = jnp.dot(h, w2_ref[...], preferred_element_type=jnp.float32) + b2_ref[...]
    out_ref[...] = y.astype(out_ref.dtype)


@functools.partial(jax.jit, static_argnames=("tile_b",))
def meta_learner_forward(x, w1, b1, w2, b2, *, tile_b=4096):
    """x: (B, D) f32; w1: (D, H); b1: (1, H); w2: (H, 7); b2: (1, 7). Returns (B, 7) f32."""
    B, D = x.shape
    H = w1.shape[1]
    O = w2.shape[1]

    x = x.astype(jnp.float32)
    w1 = w1.astype(jnp.float32)
    b1 = b1.astype(jnp.float32)
    w2 = w2.astype(jnp.float32)
    b2 = b2.astype(jnp.float32)

    # Batch tile: multiple of the 8-row sublane granularity, capped at ceil(B/2) so the
    # parallel batch axis has >=2 grid steps (megacore sharding on v7x) whenever B allows it.
    if B <= SUBLANE:
        tb = B                                   # single block == full batch dim (legal)
    else:
        tb = min(tile_b, _round_up(-(-B // 2), SUBLANE))
    grid = (pl.cdiv(B, tb),)                     # trailing partial tile handled by Pallas
                                                 # (padded rows never reach valid output rows)

    return pl.pallas_call(
        meta_learner_kernel,
        out_shape=jax.ShapeDtypeStruct((B, O), jnp.float32),
        grid_spec=pltpu.PrefetchScalarGridSpec(
            num_scalar_prefetch=0,
            grid=grid,
            in_specs=[
                pl.BlockSpec((tb, D), lambda i: (i, 0)),   # x: streamed, unpadded
                pl.BlockSpec((D, H), lambda i: (0, 0)),    # w1: resident (fetched once)
                pl.BlockSpec((1, H), lambda i: (0, 0)),    # b1: resident
                pl.BlockSpec((H, O), lambda i: (0, 0)),    # w2: resident
                pl.BlockSpec((1, O), lambda i: (0, 0)),    # b2: resident
            ],
            out_specs=pl.BlockSpec((tb, O), lambda i: (i, 0)),  # narrow (tb, 7) writeback
        ),
        compiler_params=pltpu.CompilerParams(
            dimension_semantics=("parallel",),   # batch axis is embarrassingly parallel
            # No vmem_limit_bytes: actual usage is ~1-2 MiB, default scoped VMEM suffices
            # on v5e/v6e/v7x and leaves Mosaic its internal-scratch headroom.
        ),
    )(x, w1, b1, w2, b2)


def init_params(key, input_size, num_neurons, out_size=7):
    """Deterministic init mimicking nn.Linear default (uniform +/- 1/sqrt(fan_in)).
    Weights stored as (in, out) so the kernel computes plain x @ W + b."""
    k1, k2, k3, k4 = jax.random.split(key, 4)
    bound1 = 1.0 / jnp.sqrt(jnp.float32(input_size))
    bound2 = 1.0 / jnp.sqrt(jnp.float32(num_neurons))
    w1 = jax.random.uniform(k1, (input_size, num_neurons), jnp.float32, -bound1, bound1)
    b1 = jax.random.uniform(k2, (1, num_neurons), jnp.float32, -bound1, bound1)
    w2 = jax.random.uniform(k3, (num_neurons, out_size), jnp.float32, -bound2, bound2)
    b2 = jax.random.uniform(k4, (1, out_size), jnp.float32, -bound2, bound2)
    return w1, b1, w2, b2


def reference_forward(x, w1, b1, w2, b2):
    """Pure-JAX f32 reference (PyTorch eval-mode semantics)."""
    h = x @ w1 + b1
    h = jnp.where(h >= 0.0, h, 0.01 * h)
    return h @ w2 + b2


if __name__ == "__main__":
    key = jax.random.PRNGKey(0)
    kx, kp = jax.random.split(key)

    batch = 8
    input_size = 16      # e.g. stacked base-model scores
    num_neurons = 32

    x = jax.random.normal(kx, (batch, input_size), jnp.float32)
    w1, b1, w2, b2 = init_params(kp, input_size, num_neurons)

    out = meta_learner_forward(x, w1, b1, w2, b2)
    out = jax.block_until_ready(out)

    ref = reference_forward(x, w1, b1, w2, b2)
    assert out.shape == (batch, 7), out.shape
    # f32 end-to-end (f32 MXU accumulation) -> tight tolerance vs the f32 reference.
    assert jnp.allclose(out, ref, atol=1e-4, rtol=1e-4), "mismatch vs reference"

    print("KERNEL_OK")
</pallas_src>

<mosaic_0001>
module attributes {stable_mosaic.version = 11 : i64} {
  func.func @meta_learner_kernel(%arg0: i32, %arg1: memref<8x16xf32, #tpu.memory_space<vmem>>, %arg2: memref<16x32xf32, #tpu.memory_space<vmem>>, %arg3: memref<1x32xf32, #tpu.memory_space<vmem>>, %arg4: memref<32x7xf32, #tpu.memory_space<vmem>>, %arg5: memref<1x7xf32, #tpu.memory_space<vmem>>, %arg6: memref<8x7xf32, #tpu.memory_space<vmem>>) attributes {dimension_semantics = [#tpu.dimension_semantics<parallel>], iteration_bounds = array<i64: 1>, scalar_prefetch = 0 : i64, scratch_operands = 0 : i64, tpu.core_type = #tpu.core_type<tc>, window_params = [{transform_indices = @transform_0, window_bounds = array<i64: 8, 16>}, {pipeline_mode = #tpu.pipeline_mode<synchronous>, transform_indices = @transform_1, window_bounds = array<i64: 16, 32>}, {pipeline_mode = #tpu.pipeline_mode<synchronous>, transform_indices = @transform_2, window_bounds = array<i64: 1, 32>}, {pipeline_mode = #tpu.pipeline_mode<synchronous>, transform_indices = @transform_3, window_bounds = array<i64: 32, 7>}, {pipeline_mode = #tpu.pipeline_mode<synchronous>, transform_indices = @transform_4, window_bounds = array<i64: 1, 7>}, {transform_indices = @transform_5, window_bounds = array<i64: 8, 7>}]} {
    %c0 = arith.constant 0 : index
    %c0_0 = arith.constant 0 : index
    %0 = vector.load %arg1[%c0, %c0_0] : memref<8x16xf32, #tpu.memory_space<vmem>>, vector<8x16xf32>
    %c0_1 = arith.constant 0 : index
    %c0_2 = arith.constant 0 : index
    %1 = vector.load %arg2[%c0_1, %c0_2] : memref<16x32xf32, #tpu.memory_space<vmem>>, vector<16x32xf32>
    %cst = arith.constant dense<0.000000e+00> : vector<8x32xf32>
    %2 = tpu.matmul %0, %1, %cst {dimension_numbers = #tpu.dot_dimension_numbers<[1], [0], [0], [1], [0, 0, 1, 1], [], []>} : vector<8x16xf32>, vector<16x32xf32>, vector<8x32xf32> -> vector<8x32xf32>
    %c0_3 = arith.constant 0 : index
    %c0_4 = arith.constant 0 : index
    %3 = vector.load %arg3[%c0_3, %c0_4] : memref<1x32xf32, #tpu.memory_space<vmem>>, vector<1x32xf32>
    %4 = vector.broadcast %3 : vector<1x32xf32> to vector<8x32xf32>
    %5 = arith.addf %2, %4 : vector<8x32xf32>
    %cst_5 = arith.constant 0.000000e+00 : f32
    %6 = vector.broadcast %cst_5 : f32 to vector<8x32xf32>
    %7 = arith.cmpf oge, %5, %6 : vector<8x32xf32>
    %cst_6 = arith.constant 0.00999999977 : f32
    %8 = vector.broadcast %cst_6 : f32 to vector<8x32xf32>
    %9 = arith.mulf %8, %5 : vector<8x32xf32>
    %10 = arith.select %7, %5, %9 : vector<8x32xi1>, vector<8x32xf32>
    %c0_7 = arith.constant 0 : index
    %c0_8 = arith.constant 0 : index
    %11 = vector.load %arg4[%c0_7, %c0_8] : memref<32x7xf32, #tpu.memory_space<vmem>>, vector<32x7xf32>
    %cst_9 = arith.constant dense<0.000000e+00> : vector<8x7xf32>
    %12 = tpu.matmul %10, %11, %cst_9 {dimension_numbers = #tpu.dot_dimension_numbers<[1], [0], [0], [1], [0, 0, 1, 1], [], []>} : vector<8x32xf32>, vector<32x7xf32>, vector<8x7xf32> -> vector<8x7xf32>
    %c0_10 = arith.constant 0 : index
    %c0_11 = arith.constant 0 : index
    %13 = vector.load %arg5[%c0_10, %c0_11] : memref<1x7xf32, #tpu.memory_space<vmem>>, vector<1x7xf32>
    %14 = vector.broadcast %13 : vector<1x7xf32> to vector<8x7xf32>
    %15 = arith.addf %12, %14 : vector<8x7xf32>
    %c0_12 = arith.constant 0 : index
    %c0_13 = arith.constant 0 : index
    %16 = vector.load %arg6[%c0_12, %c0_13] : memref<8x7xf32, #tpu.memory_space<vmem>>, vector<8x7xf32>
    tpu.vector_store %arg6[%c0_12, %c0_13], %15 {strides = array<i32>} : memref<8x7xf32, #tpu.memory_space<vmem>>, vector<8x7xf32>,
    return
  }
  func.func @transform_0(%arg0: i32) -> (i32, i32) {
    %c0_i32 = arith.constant 0 : i32
    %c0_i32_0 = arith.constant 0 : i32
    return %arg0, %c0_i32 : i32, i32
  }
  func.func @transform_1(%arg0: i32) -> (i32, i32) {
    %c0_i32 = arith.constant 0 : i32
    %c0_i32_0 = arith.constant 0 : i32
    %c0_i32_1 = arith.constant 0 : i32
    return %c0_i32, %c0_i32_0 : i32, i32
  }
  func.func @transform_2(%arg0: i32) -> (i32, i32) {
    %c0_i32 = arith.constant 0 : i32
    %c0_i32_0 = arith.constant 0 : i32
    %c0_i32_1 = arith.constant 0 : i32
    return %c0_i32, %c0_i32_0 : i32, i32
  }
  func.func @transform_3(%arg0: i32) -> (i32, i32) {
    %c0_i32 = arith.constant 0 : i32
    %c0_i32_0 = arith.constant 0 : i32
    %c0_i32_1 = arith.constant 0 : i32
    return %c0_i32, %c0_i32_0 : i32, i32
  }
  func.func @transform_4(%arg0: i32) -> (i32, i32) {
    %c0_i32 = arith.constant 0 : i32
    %c0_i32_0 = arith.constant 0 : i32
    %c0_i32_1 = arith.constant 0 : i32
    return %c0_i32, %c0_i32_0 : i32, i32
  }
  func.func @transform_5(%arg0: i32) -> (i32, i32) {
    %c0_i32 = arith.constant 0 : i32
    %c0_i32_0 = arith.constant 0 : i32
    return %arg0, %c0_i32 : i32, i32
  }
}

</mosaic_0001>

<bundles_post_ra>
// kernel: meta_learner_forward.1
= control target key start
LH: loop header
LB: loop body
LE: loop exit
PB: predicated region body
PF: predicated region fallthrough
CT: control target
= control target key end

     0   :  { %vm28_vm0 = vcmask 130048   ;;  %s197_s0 = inlined_call_operand.vmem [shape: f32[8,16], index: 0, kind: input, shape index: {}]   ;;  %s198_s1 = inlined_call_operand.vmem [shape: f32[16,32], index: 1, kind: input, shape index: {}]   ;;  %s199_s2 = inlined_call_operand.vmem [shape: f32[1,32], index: 2, kind: input, shape index: {}]   ;;  %s200_s3 = inlined_call_operand.vmem [shape: f32[32,7], index: 3, kind: input, shape index: {}]   ;;  %s201_s4 = inlined_call_operand.vmem [shape: f32[1,7], index: 4, kind: input, shape index: {}]   ;;  %s202_s5 = inlined_call_operand.hbm [shape: f32[8,7], index: 5, kind: output, shape index: {}]  }
   0x1   :  { %v23_v0 = vld [vmem:[%s198_s1 + $0x8] sm:$0xff]  ;;  %v22_v1 = vld [vmem:[%s198_s1] sm:$0xff]  ;;  %v58_v3 = vld [vmem:[%s200_s3 + $0x18] sm:$0xff] }
   0x2   :  { %46 = vmatpush.msra.mxu0 %v23_v0  ;;  %v21_v2 = vld [vmem:[%s197_s0] sm:$0xff]  ;;  %79 = vmatpush.msra.mxu1 %v58_v3 }
   0x3   :  { %10 = vsyncpa [#allocation3], 0  ;;  %v57_v4 = vld [vmem:[%s200_s3 + $0x10] sm:$0xff]  ;;  %v56_v5 = vld [vmem:[%s200_s3 + $0x8] sm:$0xff]  ;;  %vm63_vm2 = vcmask 261120   ;;  %s136_s9 = smov [#allocation2]  }
   0x4   :  { %47 = vmatpush.msra.mxu0 %v22_v1  ;;  %80 = vmatpush.msra.mxu1 %v57_v4  ;;  %v55_v6 = vld [vmem:[%s200_s3] sm:$0xff]  ;;  %s94_s10 = sshll.u32 %s136_s9, 4  ;;  %s96_s12 = sshll.u32 %s202_s5, 4  ;;  %vm87_vm3 = vcmask 56320   ;;  %s95_s10 = int_to_ptr.vmem [resolvable:$true] %s94_s10  ;;  %s97_s12 = int_to_ptr.hbm [resolvable:$true] %s96_s12 }
   0x5   :  { %105 = vmatmul.msk.f32.vlgmr.msra.gmra.mxu0 %vm28_vm0, %v21_v2  ;;  %v108_v7 = vld [vmem:[%s199_s2] ss:$0 sm:$0xff] }
   0x6   :  { %81 = vmatpush.msra.mxu1 %v56_v5  ;;  %v109_v12 = vld [vmem:[%s201_s4] ss:$0 sm:$0xff] }
   0x8   :  { %82 = vmatpush.msra.mxu1 %v55_v6 }
  0x82   :  { %v49_v8 = vpop.f32.mrf.mxu0 }
  0x83   :  { %v50_v9 = vadd.f32 %v108_v7, %v49_v8 }
  0x85   :  { %v53_v10 = vmul.f32 0.01, %v50_v9  ;;  %vm52_vm1 = vcmp.ge.f32.partialorder %v50_v9, 0.0 }
  0x87   :  { %v54_v11 = vsel %vm52_vm1, %v50_v9, %v53_v10 }
  0x88   :  { %106 = vmatmul.msk.f32.vlgmr.msra.gmra.mxu1 %vm63_vm2, %v54_v11 }
 0x105   :  { %v84_v13 = vpop.f32.mrf.mxu1 }
 0x106   :  { %v85_v14 = vadd.f32 %v109_v12, %v84_v13 }
 0x108   :  { %88 = vst.msk [vmem:[#allocation2] sm:$0xff] %vm87_vm3, %v85_v14 }
 0x109   :  { %99 = dma.vmem_to_hbm [thread:$0]  %s95_s10, 128, %s97_s12, [#allocation3]  }
 0x10a   :  { %134 = dma.done.wait [#allocation3], 128  }
 0x10b   :  { %135 = vsyncadd [#allocation3], 4294967168 }
 0x10c   :  { %104 = vsyncpa [#allocation3], 1 }

</bundles_post_ra>
